<compile_context>
chip_gen: v5e
topology: v5e:2x2
jax: 0.10.0
libtpu: 0.0.40
codegen_flags: <defaults>
</compile_context>

<pallas_src>
import jax
import jax.numpy as jnp
from jax.experimental import pallas as pl
from jax.experimental.pallas import tpu as pltpu

IN_FEATURES = 952
OUT_FEATURES = 336
TILE_B_CAP = 1024        # ~12 MiB live VMEM at this tile: fits v5e's 16 MiB default


def _round_up(n, m):
    return -(-n // m) * m


def _linear_clamp_kernel(x_ref, w_ref, b_ref, o_ref):
    # x_ref: (tile_b, 952); w_ref: (952, 336) bf16 pre-scaled by 1/6;
    # b_ref: (1, 336) f32 pre-scaled by 1/6; o_ref: (tile_b, 336) f32.
    x = x_ref[...].astype(jnp.bfloat16)                       # native bf16 MXU path
    y = jnp.dot(x, w_ref[...], preferred_element_type=jnp.float32)
    y = y + b_ref[...]                                        # broadcast bias
    # (min(v2, 6) + 3) * (1/6)  ==  min(v2/6, 1) + 0.5   (1/6 folded into W, b)
    o_ref[...] = (jnp.minimum(y, 1.0) + 0.5).astype(o_ref.dtype)


def prepare_params(w_t, b):
    """One-time host-side prep: fold the 1/6 epilogue scale into the weight and
    bias and cast the weight to bf16. No output-dim padding (lane-dense 336-col
    store is taken directly; the kernel is HBM-bound so padded writes lose)."""
    w_prepped = (w_t.astype(jnp.float32) * (1.0 / 6.0)).astype(jnp.bfloat16)
    b_prepped = (b.astype(jnp.float32) * (1.0 / 6.0)).reshape(1, OUT_FEATURES)
    return w_prepped, b_prepped


def model_forward(x, w_prepped, b_prepped):
    """x: (B, ...) with prod(trailing dims) == 952 (row-major flatten matches
    torch.flatten(1, -1)). x may be f32 or bf16 (kernel casts to bf16 itself).
    w_prepped: (952, 336) bf16; b_prepped: (1, 336) f32 (from prepare_params)."""
    batch = x.shape[0]
    x_flat = x.reshape(batch, -1)
    assert x_flat.shape[1] == IN_FEATURES

    # Batch tile: multiple of 8 (sublanes), capped for VMEM, and sized so the
    # grid has >= 2 steps when possible (v7x runs the "parallel" axis on 2 TCs).
    tile_b = min(TILE_B_CAP, _round_up(pl.cdiv(batch, 2), 8))
    grid = (pl.cdiv(batch, tile_b),)   # partial tail block masked by Pallas

    cost = pl.CostEstimate(
        flops=2 * batch * IN_FEATURES * OUT_FEATURES,
        transcendentals=0,
        bytes_accessed=(batch * IN_FEATURES * x_flat.dtype.itemsize  # x
                        + IN_FEATURES * OUT_FEATURES * 2             # weight (bf16)
                        + OUT_FEATURES * 4                           # bias
                        + batch * OUT_FEATURES * 4),                 # out (f32)
    )

    out = pl.pallas_call(
        _linear_clamp_kernel,
        out_shape=jax.ShapeDtypeStruct((batch, OUT_FEATURES), jnp.float32),
        grid=grid,
        in_specs=[
            pl.BlockSpec((tile_b, IN_FEATURES), lambda i: (i, 0)),         # x tile
            pl.BlockSpec((IN_FEATURES, OUT_FEATURES), lambda i: (0, 0)),   # weight, resident
            pl.BlockSpec((1, OUT_FEATURES), lambda i: (0, 0)),             # bias, resident
        ],
        out_specs=pl.BlockSpec((tile_b, OUT_FEATURES), lambda i: (i, 0)),
        compiler_params=pltpu.CompilerParams(
            dimension_semantics=("parallel",)),
        cost_estimate=cost,
    )(x_flat, w_prepped, b_prepped)

    return out


if __name__ == "__main__":
    key = jax.random.PRNGKey(0)
    k_x, k_w, k_b = jax.random.split(key, 3)

    # Small input consistent with Linear(952, 336): (batch=2, 8, 119) -> 952.
    x = jax.random.normal(k_x, (2, 8, 119), dtype=jnp.float32)

    # Deterministic params mimicking torch.nn.Linear init U(-1/sqrt(k), 1/sqrt(k)).
    bound = 1.0 / (IN_FEATURES ** 0.5)
    w_t = jax.random.uniform(
        k_w, (IN_FEATURES, OUT_FEATURES), jnp.float32, minval=-bound, maxval=bound
    )
    b = jax.random.uniform(
        k_b, (OUT_FEATURES,), jnp.float32, minval=-bound, maxval=bound
    )

    w_prepped, b_prepped = prepare_params(w_t, b)

    out = model_forward(x, w_prepped, b_prepped)
    jax.block_until_ready(out)

    # Pure-JAX f32 reference of the module's math. Kernel uses bf16 weights /
    # activations with f32 accumulation, so compare at bf16-appropriate tolerance.
    ref = x.reshape(x.shape[0], -1) @ w_t + b
    ref = (jnp.minimum(ref, 6.0) + 3.0) * (1.0 / 6.0)
    assert out.shape == (2, OUT_FEATURES)
    assert jnp.allclose(out, ref, atol=5e-3, rtol=5e-3), float(
        jnp.max(jnp.abs(out - ref))
    )

    print("KERNEL_OK")
</pallas_src>

<mosaic_0001>
module attributes {stable_mosaic.version = 11 : i64} {
  func.func @_linear_clamp_kernel(%arg0: i32, %arg1: memref<8x952xf32, #tpu.memory_space<vmem>>, %arg2: memref<952x336xbf16, #tpu.memory_space<vmem>>, %arg3: memref<1x336xf32, #tpu.memory_space<vmem>>, %arg4: memref<8x336xf32, #tpu.memory_space<vmem>>) attributes {dimension_semantics = [#tpu.dimension_semantics<parallel>], iteration_bounds = array<i64: 1>, scalar_prefetch = 0 : i64, scratch_operands = 0 : i64, tpu.core_type = #tpu.core_type<tc>, window_params = [{transform_indices = @transform_0, window_bounds = array<i64: 8, 952>}, {pipeline_mode = #tpu.pipeline_mode<synchronous>, transform_indices = @transform_1, window_bounds = array<i64: 952, 336>}, {pipeline_mode = #tpu.pipeline_mode<synchronous>, transform_indices = @transform_2, window_bounds = array<i64: 1, 336>}, {transform_indices = @transform_3, window_bounds = array<i64: 8, 336>}]} {
    %c0 = arith.constant 0 : index
    %c0_0 = arith.constant 0 : index
    %0 = vector.load %arg1[%c0, %c0_0] : memref<8x952xf32, #tpu.memory_space<vmem>>, vector<8x952xf32>
    %1 = arith.truncf %0 : vector<8x952xf32> to vector<8x952xbf16>
    %c0_1 = arith.constant 0 : index
    %c0_2 = arith.constant 0 : index
    %2 = vector.load %arg2[%c0_1, %c0_2] : memref<952x336xbf16, #tpu.memory_space<vmem>>, vector<952x336xbf16>
    %cst = arith.constant dense<0.000000e+00> : vector<8x336xf32>
    %3 = tpu.matmul %1, %2, %cst {dimension_numbers = #tpu.dot_dimension_numbers<[1], [0], [0], [1], [0, 0, 1, 1], [], []>} : vector<8x952xbf16>, vector<952x336xbf16>, vector<8x336xf32> -> vector<8x336xf32>
    %c0_3 = arith.constant 0 : index
    %c0_4 = arith.constant 0 : index
    %4 = vector.load %arg3[%c0_3, %c0_4] : memref<1x336xf32, #tpu.memory_space<vmem>>, vector<1x336xf32>
    %5 = vector.broadcast %4 : vector<1x336xf32> to vector<8x336xf32>
    %6 = arith.addf %3, %5 : vector<8x336xf32>
    %cst_5 = arith.constant 1.000000e+00 : f32
    %7 = vector.broadcast %cst_5 : f32 to vector<8x336xf32>
    %8 = arith.minimumf %6, %7 : vector<8x336xf32>
    %cst_6 = arith.constant 5.000000e-01 : f32
    %9 = vector.broadcast %cst_6 : f32 to vector<8x336xf32>
    %10 = arith.addf %8, %9 : vector<8x336xf32>
    %c0_7 = arith.constant 0 : index
    %c0_8 = arith.constant 0 : index
    %11 = vector.load %arg4[%c0_7, %c0_8] : memref<8x336xf32, #tpu.memory_space<vmem>>, vector<8x336xf32>
    tpu.vector_store %arg4[%c0_7, %c0_8], %10 {strides = array<i32>} : memref<8x336xf32, #tpu.memory_space<vmem>>, vector<8x336xf32>,
    return
  }
  func.func @transform_0(%arg0: i32) -> (i32, i32) {
    %c0_i32 = arith.constant 0 : i32
    %c0_i32_0 = arith.constant 0 : i32
    return %arg0, %c0_i32 : i32, i32
  }
  func.func @transform_1(%arg0: i32) -> (i32, i32) {
    %c0_i32 = arith.constant 0 : i32
    %c0_i32_0 = arith.constant 0 : i32
    %c0_i32_1 = arith.constant 0 : i32
    return %c0_i32, %c0_i32_0 : i32, i32
  }
  func.func @transform_2(%arg0: i32) -> (i32, i32) {
    %c0_i32 = arith.constant 0 : i32
    %c0_i32_0 = arith.constant 0 : i32
    %c0_i32_1 = arith.constant 0 : i32
    return %c0_i32, %c0_i32_0 : i32, i32
  }
  func.func @transform_3(%arg0: i32) -> (i32, i32) {
    %c0_i32 = arith.constant 0 : i32
    %c0_i32_0 = arith.constant 0 : i32
    return %arg0, %c0_i32 : i32, i32
  }
}

</mosaic_0001>

<bundles_post_ra>
// kernel: tpu_custom_call.1
= control target key start
LH: loop header
LB: loop body
LE: loop exit
PB: predicated region body
PF: predicated region fallthrough
CT: control target
= control target key end

     0   :  { %8 = vsyncpa [#allocation3], 0  ;;  %vm1273_vm0 = vcmask 1043456   ;;  %vm1269_vm1 = vcmask 457728   ;;  %vm1606_vm2 = vcmask 1041408   ;;  %vm1609_vm3 = vcmask 1043458   ;;  %s3750_s0 = inlined_call_operand.vmem [shape: f32[2,952], index: 0, kind: input, shape index: {}]   ;;  %s3751_s1 = inlined_call_operand.vmem [shape: bf16[952,336], index: 1, kind: input, shape index: {}]   ;;  %s3752_s2 = inlined_call_operand.vmem [shape: f32[1,336], index: 2, kind: input, shape index: {}]   ;;  %s3753_s3 = inlined_call_operand.hbm [shape: f32[2,336], index: 3, kind: output, shape index: {}]  }
   0x1   :  { %v1737_v0 = vld [vmem:[%s3751_s1 + $0xa8] sm:$0xf]  ;;  %v2384_v1 = vld [vmem:[%s3751_s1 + $0xb0] sm:$0xf0]  ;;  %v1725_v12 = vld [vmem:[%s3751_s1 + $0x90] sm:$0xf] }
   0x2   :  { %v1738_v2 = vor.u32 %v2384_v1, %v1737_v0  ;;  %v1929_v3 = vld [vmem:[%s3751_s1 + $0x228] sm:$0xf]  ;;  %v2432_v4 = vld [vmem:[%s3751_s1 + $0x230] sm:$0xf0]  ;;  %v2381_v13 = vld [vmem:[%s3751_s1 + $0x98] sm:$0xf0] }
   0x3   :  { %v2025_v5 = vld [vmem:[%s3751_s1 + $0x2e8] sm:$0xf]  ;;  %v1930_v6 = vor.u32 %v2432_v4, %v1929_v3  ;;  %v2456_v7 = vld [vmem:[%s3751_s1 + $0x2f0] sm:$0xf0]  ;;  %v1917_v14 = vld [vmem:[%s3751_s1 + $0x210] sm:$0xf]  ;;  %v1726_v15 = vor.u32 %v2381_v13, %v1725_v12 }
   0x4   :  { %v1833_v8 = vld [vmem:[%s3751_s1 + $0x168] sm:$0xf]  ;;  %v2408_v9 = vld [vmem:[%s3751_s1 + $0x170] sm:$0xf0]  ;;  %1283 = vmatpush.bf16.msra.mxu0 %v1738_v2  ;;  %v2026_v10 = vor.u32 %v2456_v7, %v2025_v5  ;;  %v2429_v16 = vld [vmem:[%s3751_s1 + $0x218] sm:$0xf0] }
   0x5   :  { %v1834_v11 = vor.u32 %v2408_v9, %v1833_v8  ;;  %1309 = vmatpush.bf16.msra.mxu2 %v1930_v6  ;;  %v2013_v17 = vld [vmem:[%s3751_s1 + $0x2d0] sm:$0xf]  ;;  %v2453_v18 = vld [vmem:[%s3751_s1 + $0x2d8] sm:$0xf0]  ;;  %v1918_v19 = vor.u32 %v2429_v16, %v1917_v14  ;;  %v1713_v23 = vld [vmem:[%s3751_s1 + $0x78] sm:$0xf] }
   0x6   :  { %1322 = vmatpush.bf16.msra.mxu3 %v2026_v10  ;;  %v2014_v20 = vor.u32 %v2453_v18, %v2013_v17  ;;  %v1821_v21 = vld [vmem:[%s3751_s1 + $0x150] sm:$0xf]  ;;  %v2405_v22 = vld [vmem:[%s3751_s1 + $0x158] sm:$0xf0]  ;;  %v2378_v25 = vld [vmem:[%s3751_s1 + $0x80] sm:$0xf0] }
   0x7   :  { %1296 = vmatpush.bf16.msra.mxu1 %v1834_v11  ;;  %v1822_v24 = vor.u32 %v2405_v22, %v1821_v21  ;;  %v1905_v26 = vld [vmem:[%s3751_s1 + $0x1f8] sm:$0xf]  ;;  %v2426_v27 = vld [vmem:[%s3751_s1 + $0x200] sm:$0xf0]  ;;  %v1714_v28 = vor.u32 %v2378_v25, %v1713_v23  ;;  %v1701_v34 = vld [vmem:[%s3751_s1 + $0x60] sm:$0xf] }
   0x8   :  { %1284 = vmatpush.bf16.msra.mxu0 %v1726_v15  ;;  %v2001_v29 = vld [vmem:[%s3751_s1 + $0x2b8] sm:$0xf]  ;;  %v2450_v30 = vld [vmem:[%s3751_s1 + $0x2c0] sm:$0xf0]  ;;  %v1906_v32 = vor.u32 %v2426_v27, %v1905_v26  ;;  %v2375_v35 = vld [vmem:[%s3751_s1 + $0x68] sm:$0xf0] }
   0x9   :  { %v1809_v31 = vld [vmem:[%s3751_s1 + $0x138] sm:$0xf]  ;;  %1310 = vmatpush.bf16.msra.mxu2 %v1918_v19  ;;  %v2402_v33 = vld [vmem:[%s3751_s1 + $0x140] sm:$0xf0]  ;;  %v2002_v36 = vor.u32 %v2450_v30, %v2001_v29  ;;  %v1893_v38 = vld [vmem:[%s3751_s1 + $0x1e0] sm:$0xf]  ;;  %v1702_v44 = vor.u32 %v2375_v35, %v1701_v34 }
   0xa   :  { %1323 = vmatpush.bf16.msra.mxu3 %v2014_v20  ;;  %v1810_v37 = vor.u32 %v2402_v33, %v1809_v31  ;;  %v2423_v39 = vld [vmem:[%s3751_s1 + $0x1e8] sm:$0xf0]  ;;  %v1989_v40 = vld [vmem:[%s3751_s1 + $0x2a0] sm:$0xf]  ;;  %v1689_v46 = vld [vmem:[%s3751_s1 + $0x48] sm:$0xf] }
   0xb   :  { %1297 = vmatpush.bf16.msra.mxu1 %v1822_v24  ;;  %v2447_v41 = vld [vmem:[%s3751_s1 + $0x2a8] sm:$0xf0]  ;;  %v1797_v42 = vld [vmem:[%s3751_s1 + $0x120] sm:$0xf]  ;;  %v1894_v45 = vor.u32 %v2423_v39, %v1893_v38  ;;  %v2372_v47 = vld [vmem:[%s3751_s1 + $0x50] sm:$0xf0] }
   0xc   :  { %v2399_v43 = vld [vmem:[%s3751_s1 + $0x128] sm:$0xf0]  ;;  %1285 = vmatpush.bf16.msra.mxu0 %v1714_v28  ;;  %v1990_v48 = vor.u32 %v2447_v41, %v1989_v40  ;;  %v1881_v50 = vld [vmem:[%s3751_s1 + $0x1c8] sm:$0xf]  ;;  %v2420_v51 = vld [vmem:[%s3751_s1 + $0x1d0] sm:$0xf0]  ;;  %v1690_v56 = vor.u32 %v2372_v47, %v1689_v46 }
   0xd   :  { %1311 = vmatpush.bf16.msra.mxu2 %v1906_v32  ;;  %v1798_v49 = vor.u32 %v2399_v43, %v1797_v42  ;;  %v1977_v52 = vld [vmem:[%s3751_s1 + $0x288] sm:$0xf]  ;;  %v2444_v53 = vld [vmem:[%s3751_s1 + $0x290] sm:$0xf0]  ;;  %v1882_v57 = vor.u32 %v2420_v51, %v1881_v50  ;;  %v1677_v58 = vld [vmem:[%s3751_s1 + $0x30] sm:$0xf] }
   0xe   :  { %1324 = vmatpush.bf16.msra.mxu3 %v2002_v36  ;;  %v1785_v54 = vld [vmem:[%s3751_s1 + $0x108] sm:$0xf]  ;;  %v2396_v55 = vld [vmem:[%s3751_s1 + $0x110] sm:$0xf0]  ;;  %v2369_v59 = vld [vmem:[%s3751_s1 + $0x38] sm:$0xf0]  ;;  %v1978_v60 = vor.u32 %v2444_v53, %v1977_v52 }
   0xf   :  { %1298 = vmatpush.bf16.msra.mxu1 %v1810_v37  ;;  %v1786_v61 = vor.u32 %v2396_v55, %v1785_v54  ;;  %v1869_v62 = vld [vmem:[%s3751_s1 + $0x1b0] sm:$0xf]  ;;  %v2417_v63 = vld [vmem:[%s3751_s1 + $0x1b8] sm:$0xf0]  ;;  %v1678_v4 = vor.u32 %v2369_v59, %v1677_v58  ;;  %v1665_v6 = vld [vmem:[%s3751_s1 + $0x18] sm:$0xf] }
  0x10   :  { %1286 = vmatpush.bf16.msra.mxu0 %v1702_v44  ;;  %v1965_v0 = vld [vmem:[%s3751_s1 + $0x270] sm:$0xf]  ;;  %v2441_v1 = vld [vmem:[%s3751_s1 + $0x278] sm:$0xf0]  ;;  %v1870_v5 = vor.u32 %v2417_v63, %v1869_v62  ;;  %v2366_v7 = vld [vmem:[%s3751_s1 + $0x20] sm:$0xf0] }
  0x11   :  { %1312 = vmatpush.bf16.msra.mxu2 %v1894_v45  ;;  %v1773_v2 = vld [vmem:[%s3751_s1 + $0xf0] sm:$0xf]  ;;  %v2393_v3 = vld [vmem:[%s3751_s1 + $0xf8] sm:$0xf0]  ;;  %v1857_v8 = vld [vmem:[%s3751_s1 + $0x198] sm:$0xf]  ;;  %v1966_v9 = vor.u32 %v2441_v1, %v1965_v0  ;;  %v1666_v17 = vor.u32 %v2366_v7, %v1665_v6 }
  0x12   :  { %1325 = vmatpush.bf16.msra.mxu3 %v1990_v48  ;;  %v1774_v10 = vor.u32 %v2393_v3, %v1773_v2  ;;  %v2414_v11 = vld [vmem:[%s3751_s1 + $0x1a0] sm:$0xf0]  ;;  %v1953_v12 = vld [vmem:[%s3751_s1 + $0x258] sm:$0xf]  ;;  %v2762_v16 = vld [vmem:[%s3751_s1 + $0x588] sm:$0xff]  ;;  %vm1614_vm4 = vcmask 1045508  }
  0x13   :  { %1299 = vmatpush.bf16.msra.mxu1 %v1798_v49  ;;  %v2438_v13 = vld [vmem:[%s3751_s1 + $0x260] sm:$0xf0]  ;;  %v1761_v14 = vld [vmem:[%s3751_s1 + $0xd8] sm:$0xf]  ;;  %v1653_v18 = vld [vmem:[%s3751_s1] sm:$0xf]  ;;  %v909_v19 = vunpack.c.l.b16 %v2762_v16  ;;  %v1858_v20 = vor.u32 %v2414_v11, %v1857_v8 }
  0x14   :  { %1287 = vmatpush.bf16.msra.mxu0 %v1690_v56  ;;  %v2390_v15 = vld [vmem:[%s3751_s1 + $0xe0] sm:$0xf0]  ;;  %v2363_v21 = vld [vmem:[%s3751_s1 + $0x8] sm:$0xf0]  ;;  %v1845_v22 = vld [vmem:[%s3751_s1 + $0x180] sm:$0xf]  ;;  %v1954_v24 = vor.u32 %v2438_v13, %v1953_v12 }
  0x15   :  { %1313 = vmatpush.bf16.msra.mxu2 %v1882_v57  ;;  %v2411_v23 = vld [vmem:[%s3751_s1 + $0x188] sm:$0xf0]  ;;  %v1762_v25 = vor.u32 %v2390_v15, %v1761_v14  ;;  %v1941_v26 = vld [vmem:[%s3751_s1 + $0x240] sm:$0xf]  ;;  %v2121_v27 = vld [vmem:[%s3751_s1 + $0x3a8] sm:$0xf]  ;;  %v1654_v32 = vor.u32 %v2363_v21, %v1653_v18  ;;  %v1089_v33 = vpack.c.b16 %v909_v19, %v909_v19 }
  0x16   :  { %1326 = vmatpush.bf16.msra.mxu3 %v1978_v60  ;;  %v2480_v28 = vld [vmem:[%s3751_s1 + $0x3b0] sm:$0xf0]  ;;  %v2435_v29 = vld [vmem:[%s3751_s1 + $0x248] sm:$0xf0]  ;;  %v2313_v30 = vld [vmem:[%s3751_s1 + $0x528] sm:$0xf]  ;;  %v1846_v36 = vor.u32 %v2411_v23, %v1845_v22 }
  0x17   :  { %1300 = vmatpush.bf16.msra.mxu1 %v1786_v61  ;;  %v2528_v31 = vld [vmem:[%s3751_s1 + $0x530] sm:$0xf0]  ;;  %v1749_v34 = vld [vmem:[%s3751_s1 + $0xc0] sm:$0xf]  ;;  %v2387_v35 = vld [vmem:[%s3751_s1 + $0xc8] sm:$0xf0]  ;;  %v2122_v37 = vor.u32 %v2480_v28, %v2121_v27  ;;  %v1942_v40 = vor.u32 %v2435_v29, %v1941_v26 }
  0x18   :  { %1288 = vmatpush.bf16.msra.mxu0 %v1678_v4  ;;  %v2217_v38 = vld [vmem:[%s3751_s1 + $0x468] sm:$0xf]  ;;  %v2504_v39 = vld [vmem:[%s3751_s1 + $0x470] sm:$0xf0]  ;;  %v2314_v41 = vor.u32 %v2528_v31, %v2313_v30  ;;  %v2109_v42 = vld [vmem:[%s3751_s1 + $0x390] sm:$0xf]  ;;  %v1750_v45 = vor.u32 %v2387_v35, %v1749_v34 }
  0x19   :  { %1314 = vmatpush.bf16.msra.mxu2 %v1870_v5  ;;  %v2477_v43 = vld [vmem:[%s3751_s1 + $0x398] sm:$0xf0]  ;;  %v16_v44 = vld [vmem:[%s3750_s0] sm:$0xff]  ;;  %v2301_v46 = vld [vmem:[%s3751_s1 + $0x510] sm:$0xf]  ;;  %v1275_v49 = vsel %vm1273_vm0, %v1089_v33, 0  ;;  %v2218_v50 = vor.u32 %v2504_v39, %v2217_v38 }
  0x1a   :  { %1327 = vmatpush.bf16.msra.mxu3 %v1966_v9  ;;  %v2525_v47 = vld [vmem:[%s3751_s1 + $0x518] sm:$0xf0]  ;;  %v2349_v48 = vld [vmem:[%s3751_s1 + $0x570] sm:$0xf]  ;;  %v2110_v54 = vor.u32 %v2477_v43, %v2109_v42  ;;  %v20_v56 = vld [vmem:[%s3750_s0 + $0x20] sm:$0xff]  ;;  %vm1618_vm5 = vcmask 1045504  }
  0x1b   :  { %1301 = vmatpush.bf16.msra.mxu1 %v1774_v10  ;;  %v2537_v51 = vld [vmem:[%s3751_s1 + $0x578] sm:$0xf0]  ;;  %v2205_v52 = vld [vmem:[%s3751_s1 + $0x450] sm:$0xf]  ;;  %32 = vst [vmem:[#allocation1] ss:$4 sm:$0xff] %v16_v44  ;;  %v2302_v58 = vor.u32 %v2525_v47, %v2301_v46  ;;  %vm1626_vm6 = vmor %vm1609_vm3, %vm1606_vm2 }
  0x1c   :  { %1289 = vmatpush.bf16.msra.mxu0 %v1666_v17  ;;  %v18_v53 = vld [vmem:[%s3750_s0 + $0x10] sm:$0xff]  ;;  %v2501_v55 = vld [vmem:[%s3751_s1 + $0x458] sm:$0xf0]  ;;  %v2097_v59 = vld [vmem:[%s3751_s1 + $0x378] sm:$0xf]  ;;  %v2350_v61 = vor.u32 %v2537_v51, %v2349_v48  ;;  %vm1627_vm7 = vcmask 652292  }
  0x1d   :  { %1315 = vmatpush.bf16.msra.mxu2 %v1858_v20  ;;  %v22_v57 = vld [vmem:[%s3750_s0 + $0x30] sm:$0xff]  ;;  %v2474_v60 = vld [vmem:[%s3751_s1 + $0x380] sm:$0xf0]  ;;  %34 = vst [vmem:[#allocation1 + $0x1] ss:$4 sm:$0xff] %v18_v53  ;;  %v2206_v0 = vor.u32 %v2501_v55, %v2205_v52  ;;  %vm1611_vm8 = vcmask 1045506   ;;  %vm1628_vm9 = vmor %vm1627_vm7, %vm1626_vm6 }
  0x1e   :  { %1328 = vmatpush.bf16.msra.mxu3 %v1954_v24  ;;  %v2289_v62 = vld [vmem:[%s3751_s1 + $0x4f8] sm:$0xf]  ;;  %v2522_v63 = vld [vmem:[%s3751_s1 + $0x500] sm:$0xf0]  ;;  %36 = vst [vmem:[#allocation1 + $0x2] ss:$4 sm:$0xff] %v20_v56  ;;  %v2098_v3 = vor.u32 %v2474_v60, %v2097_v59 }
  0x1f   :  { %1302 = vmatpush.bf16.msra.mxu1 %v1762_v25  ;;  %v2337_v1 = vld [vmem:[%s3751_s1 + $0x558] sm:$0xf]  ;;  %v2534_v2 = vld [vmem:[%s3751_s1 + $0x560] sm:$0xf0]  ;;  %38 = vst [vmem:[#allocation1 + $0x3] ss:$4 sm:$0xff] %v22_v57  ;;  %v2290_v6 = vor.u32 %v2522_v63, %v2289_v62 }
  0x20   :  { %1290 = vmatpush.bf16.msra.mxu0 %v1654_v32  ;;  %v2193_v4 = vld [vmem:[%s3751_s1 + $0x438] sm:$0xf]  ;;  %v2498_v5 = vld [vmem:[%s3751_s1 + $0x440] sm:$0xf0]  ;;  %v2085_v7 = vld [vmem:[%s3751_s1 + $0x360] sm:$0xf]  ;;  %v2338_v9 = vor.u32 %v2534_v2, %v2337_v1 }
  0x21   :  { %1316 = vmatpush.bf16.msra.mxu2 %v1846_v36  ;;  %v2471_v8 = vld [vmem:[%s3751_s1 + $0x368] sm:$0xf0]  ;;  %v2277_v10 = vld [vmem:[%s3751_s1 + $0x4e0] sm:$0xf]  ;;  %v2194_v13 = vor.u32 %v2498_v5, %v2193_v4  ;;  %v1739_v17 = vld [vmem:[%s3751_s1 + $0xb4] sm:$0xf0] }
  0x22   :  { %1329 = vmatpush.bf16.msra.mxu3 %v1942_v40  ;;  %v2519_v11 = vld [vmem:[%s3751_s1 + $0x4e8] sm:$0xf0]  ;;  %v2325_v12 = vld [vmem:[%s3751_s1 + $0x540] sm:$0xf]  ;;  %v2086_v18 = vor.u32 %v2471_v8, %v2085_v7  ;;  %v2073_v21 = vld [vmem:[%s3751_s1 + $0x348] sm:$0xf] }
  0x23   :  { %1303 = vmatpush.bf16.msra.mxu1 %v1750_v45  ;;  %v2531_v14 = vld [vmem:[%s3751_s1 + $0x548] sm:$0xf0]  ;;  %v2181_v19 = vld [vmem:[%s3751_s1 + $0x420] sm:$0xf]  ;;  %v2278_v22 = vor.u32 %v2519_v11, %v2277_v10  ;;  %v2468_v23 = vld [vmem:[%s3751_s1 + $0x350] sm:$0xf0] }
  0x24   :  { %1335 = vmatpush.bf16.msrb.mxu0 %v2122_v37  ;;  %v2383_v15 = vld [vmem:[%s3751_s1 + $0xac] sm:$0xf]  ;;  %v2265_v24 = vld [vmem:[%s3751_s1 + $0x4c8] sm:$0xf]  ;;  %v2516_v25 = vld [vmem:[%s3751_s1 + $0x4d0] sm:$0xf0]  ;;  %v2326_v26 = vor.u32 %v2531_v14, %v2325_v12  ;;  %v2074_v37 = vor.u32 %v2468_v23, %v2073_v21 }
  0x25   :  { %1361 = vmatpush.bf16.msrb.mxu2 %v2314_v41  ;;  %v2495_v20 = vld [vmem:[%s3751_s1 + $0x428] sm:$0xf0]  ;;  %v2380_v29 = vld [vmem:[%s3751_s1 + $0x94] sm:$0xf]  ;;  %v1742_v31 = vor.u32 %v2383_v15, %v1739_v17  ;;  %v1727_v38 = vld [vmem:[%s3751_s1 + $0x9c] sm:$0xf0]  ;;  %v2266_v41 = vor.u32 %v2516_v25, %v2265_v24 }
  0x26   :  { %1378 = vmatpush.bf16.msrb.mxu3 %v1275_v49  ;;  %v50_v27 = vld.sshfl [vmem:[#allocation1 + $0x18] sm:$0xff pattern:$0x73625140]  ;;  %v47_v28 = vld.sshfl [vmem:[#allocation1] sm:$0xff pattern:$0x73625140]  ;;  %v2182_v32 = vor.u32 %v2495_v20, %v2181_v19  ;;  %v1730_v49 = vor.u32 %v2380_v29, %v1727_v38 }
  0x27   :  { %1348 = vmatpush.bf16.msrb.mxu1 %v2218_v50  ;;  %v2913_v30 = vpack.c.bf16 %v50_v27, %v50_v27  ;;  %v2915_v33 = vpack.c.bf16 %v47_v28, %v47_v28  ;;  %v49_v34 = vld.sshfl [vmem:[#allocation1 + $0x10] sm:$0xff pattern:$0x73625140]  ;;  %v48_v35 = vld.sshfl [vmem:[#allocation1 + $0x8] sm:$0xff pattern:$0x73625140] }
  0x28   :  { %1336 = vmatpush.bf16.msrb.mxu0 %v2110_v54  ;;  %v2917_v36 = vpack.c.bf16 %v49_v34, %v49_v34  ;;  %v2169_v39 = vld [vmem:[%s3751_s1 + $0x408] sm:$0xf]  ;;  %v2492_v40 = vld [vmem:[%s3751_s1 + $0x410] sm:$0xf0]  ;;  %v2929_v42 = vpack.c.bf16 %v48_v35, %v48_v35  ;;  %v2061_v43 = vld [vmem:[%s3751_s1 + $0x330] sm:$0xf] }
  0x29   :  { %1362 = vmatpush.bf16.msrb.mxu2 %v2302_v58  ;;  %1330 = vmatmul.bf16.vlgmr.msra.gmra.mxu3 %v2913_v30  ;;  %v2465_v44 = vld [vmem:[%s3751_s1 + $0x338] sm:$0xf0]  ;;  %v2253_v45 = vld [vmem:[%s3751_s1 + $0x4b0] sm:$0xf]  ;;  %v1715_v48 = vld [vmem:[%s3751_s1 + $0x84] sm:$0xf0]  ;;  %v2170_v50 = vor.u32 %v2492_v40, %v2169_v39 }
  0x2a   :  { %1379 = vmatpush.bf16.msrb.mxu3 %v2350_v61  ;;  %1291 = vmatmul.bf16.vlgmr.msra.gmra.mxu0 %v2915_v33  ;;  %v2513_v46 = vld [vmem:[%s3751_s1 + $0x4b8] sm:$0xf0]  ;;  %v2157_v51 = vld [vmem:[%s3751_s1 + $0x3f0] sm:$0xf]  ;;  %v2049_v53 = vld [vmem:[%s3751_s1 + $0x318] sm:$0xf]  ;;  %v2062_v54 = vor.u32 %v2465_v44, %v2061_v43 }
  0x2b   :  { %1349 = vmatpush.bf16.msrb.mxu1 %v2206_v0  ;;  %v2377_v47 = vld [vmem:[%s3751_s1 + $0x7c] sm:$0xf]  ;;  %1317 = vmatmul.bf16.vlgmr.msra.gmra.mxu2 %v2917_v36  ;;  %v2462_v55 = vld [vmem:[%s3751_s1 + $0x320] sm:$0xf0]  ;;  %v2241_v56 = vld [vmem:[%s3751_s1 + $0x498] sm:$0xf]  ;;  %v2254_v58 = vor.u32 %v2513_v46, %v2253_v45 }
  0x2c   :  { %1337 = vmatpush.bf16.msrb.mxu0 %v2098_v3  ;;  %v2489_v52 = vld [vmem:[%s3751_s1 + $0x3f8] sm:$0xf0]  ;;  %v2510_v57 = vld [vmem:[%s3751_s1 + $0x4a0] sm:$0xf0]  ;;  %1304 = vmatmul.bf16.vlgmr.msra.gmra.mxu1 %v2929_v42  ;;  %v17_v59 = vld [vmem:[%s3750_s0 + $0x8] sm:$0xff]  ;;  %v1718_v0 = vor.u32 %v2377_v47, %v1715_v48  ;;  %v2050_v4 = vor.u32 %v2462_v55, %v2049_v53 }
  0x2d   :  { %1363 = vmatpush.bf16.msrb.mxu2 %v2290_v6  ;;  %v19_v60 = vld [vmem:[%s3750_s0 + $0x18] sm:$0xff]  ;;  %v21_v61 = vld [vmem:[%s3750_s0 + $0x28] sm:$0xff]  ;;  %v2374_v62 = vld [vmem:[%s3751_s1 + $0x64] sm:$0xf]  ;;  %40 = vst [vmem:[#allocation1 + $0x20] ss:$4 sm:$0xff] %v17_v59  ;;  %v2158_v1 = vor.u32 %v2489_v52, %v2157_v51  ;;  %v2242_v7 = vor.u32 %v2510_v57, %v2241_v56 }
  0x2e   :  { %1380 = vmatpush.bf16.msrb.mxu3 %v2338_v9  ;;  %v23_v63 = vld [vmem:[%s3750_s0 + $0x38] sm:$0xff]  ;;  %v1703_v2 = vld [vmem:[%s3751_s1 + $0x6c] sm:$0xf0]  ;;  %42 = vst [vmem:[#allocation1 + $0x21] ss:$4 sm:$0xff] %v19_v60 }
  0x2f   :  { %1350 = vmatpush.bf16.msrb.mxu1 %v2194_v13  ;;  %v2145_v3 = vld [vmem:[%s3751_s1 + $0x3d8] sm:$0xf]  ;;  %v2486_v5 = vld [vmem:[%s3751_s1 + $0x3e0] sm:$0xf0]  ;;  %v2037_v6 = vld [vmem:[%s3751_s1 + $0x300] sm:$0xf]  ;;  %v1706_v13 = vor.u32 %v2374_v62, %v1703_v2 }
  0x30   :  { %1338 = vmatpush.bf16.msrb.mxu0 %v2086_v18  ;;  %44 = vst [vmem:[#allocation1 + $0x22] ss:$4 sm:$0xff] %v21_v61  ;;  %v2459_v8 = vld [vmem:[%s3751_s1 + $0x308] sm:$0xf0]  ;;  %v2229_v9 = vld [vmem:[%s3751_s1 + $0x480] sm:$0xf]  ;;  %v2146_v14 = vor.u32 %v2486_v5, %v2145_v3 }
  0x31   :  { %1364 = vmatpush.bf16.msrb.mxu2 %v2278_v22  ;;  %46 = vst [vmem:[#allocation1 + $0x23] ss:$4 sm:$0xff] %v23_v63  ;;  %v2507_v10 = vld [vmem:[%s3751_s1 + $0x488] sm:$0xf0]  ;;  %v1835_v12 = vld [vmem:[%s3751_s1 + $0x174] sm:$0xf0]  ;;  %v2038_v19 = vor.u32 %v2459_v8, %v2037_v6 }
  0x32   :  { %1381 = vmatpush.bf16.msrb.mxu3 %v2326_v26  ;;  %v2407_v11 = vld [vmem:[%s3751_s1 + $0x16c] sm:$0xf]  ;;  %v2027_v18 = vld [vmem:[%s3751_s1 + $0x2f4] sm:$0xf0]  ;;  %v2133_v21 = vld [vmem:[%s3751_s1 + $0x3c0] sm:$0xf]  ;;  %v2230_v23 = vor.u32 %v2507_v10, %v2229_v9 }
  0x33   :  { %1351 = vmatpush.bf16.msrb.mxu1 %v2182_v32  ;;  %v2371_v15 = vld [vmem:[%s3751_s1 + $0x4c] sm:$0xf]  ;;  %v1691_v20 = vld [vmem:[%s3751_s1 + $0x54] sm:$0xf0]  ;;  %v1838_v24 = vor.u32 %v2407_v11, %v1835_v12  ;;  %v2368_v28 = vld [vmem:[%s3751_s1 + $0x34] sm:$0xf] }
  0x34   :  { %1339 = vmatpush.bf16.msrb.mxu0 %v2074_v37  ;;  %v2455_v17 = vld [vmem:[%s3751_s1 + $0x2ec] sm:$0xf]  ;;  %v1931_v26 = vld [vmem:[%s3751_s1 + $0x234] sm:$0xf0]  ;;  %v1679_v29 = vld [vmem:[%s3751_s1 + $0x3c] sm:$0xf0]  ;;  %v1694_v32 = vor.u32 %v2371_v15, %v1691_v20 }
  0x35   :  { %1365 = vmatpush.bf16.msrb.mxu2 %v2266_v41  ;;  %v2483_v22 = vld [vmem:[%s3751_s1 + $0x3c8] sm:$0xf0]  ;;  %v2030_v27 = vor.u32 %v2455_v17, %v2027_v18  ;;  %v1823_v35 = vld [vmem:[%s3751_s1 + $0x15c] sm:$0xf0]  ;;  %v2452_v37 = vld [vmem:[%s3751_s1 + $0x2d4] sm:$0xf]  ;;  %v1682_v52 = vor.u32 %v2368_v28, %v1679_v29 }
  0x36   :  { %1387 = vmatpush.bf16.msra.mxu3 %v1742_v31  ;;  %v2431_v25 = vld [vmem:[%s3751_s1 + $0x22c] sm:$0xf]  ;;  %v2404_v31 = vld [vmem:[%s3751_s1 + $0x154] sm:$0xf]  ;;  %v2134_v34 = vor.u32 %v2483_v22, %v2133_v21  ;;  %v2015_v38 = vld [vmem:[%s3751_s1 + $0x2dc] sm:$0xf0] }
  0x37   :  { %1352 = vmatpush.bf16.msrb.mxu1 %v2170_v50  ;;  %v1934_v44 = vor.u32 %v2431_v25, %v1931_v26  ;;  %v2428_v50 = vld [vmem:[%s3751_s1 + $0x214] sm:$0xf]  ;;  %v1919_v51 = vld [vmem:[%s3751_s1 + $0x21c] sm:$0xf0]  ;;  %v2018_v53 = vor.u32 %v2452_v37, %v2015_v38  ;;  %v2401_v55 = vld [vmem:[%s3751_s1 + $0x13c] sm:$0xf] }
  0x38   :  { %1340 = vmatpush.bf16.msrb.mxu0 %v2062_v54  ;;  %v51_v39 = vld.sshfl [vmem:[#allocation1 + $0x20] sm:$0xff pattern:$0x73625140]  ;;  %v53_v40 = vld.sshfl [vmem:[#allocation1 + $0x30] sm:$0xff pattern:$0x73625140]  ;;  %v1922_v60 = vor.u32 %v2428_v50, %v1919_v51 }
  0x39   :  { %1366 = vmatpush.bf16.msrb.mxu2 %v2254_v58  ;;  %v3054_v41 = vpack.c.bf16 %v51_v39, %v51_v39  ;;  %v3056_v43 = vpack.c.bf16 %v53_v40, %v53_v40  ;;  %v52_v45 = vld.sshfl [vmem:[#allocation1 + $0x28] sm:$0xff pattern:$0x73625140]  ;;  %v54_v46 = vld.sshfl [vmem:[#allocation1 + $0x38] sm:$0xff pattern:$0x73625140] }
  0x3a   :  { %1388 = vmatpush.bf16.msra.mxu3 %v1730_v49  ;;  %v3058_v47 = vpack.c.bf16 %v52_v45, %v52_v45  ;;  %v3060_v48 = vpack.c.bf16 %v54_v46, %v54_v46  ;;  %v1826_v49 = vor.u32 %v2404_v31, %v1823_v35  ;;  %v2365_v54 = vld [vmem:[%s3751_s1 + $0x1c] sm:$0xf]  ;;  %v1811_v56 = vld [vmem:[%s3751_s1 + $0x144] sm:$0xf0]  ;;  %v2362_v2 = vld [vmem:[%s3751_s1 + $0x4] sm:$0xf]  ;;  %v910_v46 = vunpack.c.h.b16 %v2762_v16 }
  0x3b   :  { %1353 = vmatpush.bf16.msrb.mxu1 %v2158_v1  ;;  %v1667_v57 = vld [vmem:[%s3751_s1 + $0x24] sm:$0xf0]  ;;  %v2449_v58 = vld [vmem:[%s3751_s1 + $0x2bc] sm:$0xf]  ;;  %v1814_v61 = vor.u32 %v2401_v55, %v1811_v56  ;;  %v2398_v3 = vld [vmem:[%s3751_s1 + $0x124] sm:$0xf] }
  0x3c   :  { %1341 = vmatpush.bf16.msrb.mxu0 %v2050_v4  ;;  %v2003_v59 = vld [vmem:[%s3751_s1 + $0x2c4] sm:$0xf0]  ;;  %2359 = vmatmul.msk.bf16.vlgmr.msrb.gmra.mxu3 %vm1269_vm1, %v3060_v48  ;;  %v2425_v62 = vld [vmem:[%s3751_s1 + $0x1fc] sm:$0xf]  ;;  %v1799_v4 = vld [vmem:[%s3751_s1 + $0x12c] sm:$0xf0] }
  0x3d   :  { %1367 = vmatpush.bf16.msrb.mxu2 %v2242_v7  ;;  %v1907_v63 = vld [vmem:[%s3751_s1 + $0x204] sm:$0xf0]  ;;  %v2006_v1 = vor.u32 %v2449_v58, %v2003_v59  ;;  %v1655_v5 = vld [vmem:[%s3751_s1 + $0xc] sm:$0xf0]  ;;  %v2446_v6 = vld [vmem:[%s3751_s1 + $0x2a4] sm:$0xf]  ;;  %v1802_v11 = vor.u32 %v2398_v3, %v1799_v4 }
  0x3e   :  { %1389 = vmatpush.bf16.msra.mxu3 %v1718_v0  ;;  %v1670_v0 = vor.u32 %v2365_v54, %v1667_v57  ;;  %v1991_v7 = vld [vmem:[%s3751_s1 + $0x2ac] sm:$0xf0]  ;;  %v1910_v8 = vor.u32 %v2425_v62, %v1907_v63  ;;  %v2479_v9 = vld [vmem:[%s3751_s1 + $0x3ac] sm:$0xf]  ;;  %v2123_v10 = vld [vmem:[%s3751_s1 + $0x3b4] sm:$0xf0] }
  0x3f   :  { %1354 = vmatpush.bf16.msrb.mxu1 %v2146_v14  ;;  %v2422_v12 = vld [vmem:[%s3751_s1 + $0x1e4] sm:$0xf]  ;;  %v1658_v14 = vor.u32 %v2362_v2, %v1655_v5  ;;  %v1994_v15 = vor.u32 %v2446_v6, %v1991_v7  ;;  %v2395_v17 = vld [vmem:[%s3751_s1 + $0x10c] sm:$0xf]  ;;  %v1787_v18 = vld [vmem:[%s3751_s1 + $0x114] sm:$0xf0] }
  0x40   :  { %1342 = vmatpush.bf16.msrb.mxu0 %v2038_v19  ;;  %v2126_v19 = vor.u32 %v2479_v9, %v2123_v10  ;;  %v2443_v20 = vld [vmem:[%s3751_s1 + $0x28c] sm:$0xf]  ;;  %v1979_v21 = vld [vmem:[%s3751_s1 + $0x294] sm:$0xf0]  ;;  %v1790_v25 = vor.u32 %v2395_v17, %v1787_v18  ;;  %v2392_v29 = vld [vmem:[%s3751_s1 + $0xf4] sm:$0xf] }
  0x41   :  { %1368 = vmatpush.bf16.msrb.mxu2 %v2230_v23  ;;  %v2476_v23 = vld [vmem:[%s3751_s1 + $0x394] sm:$0xf]  ;;  %v2419_v26 = vld [vmem:[%s3751_s1 + $0x1cc] sm:$0xf]  ;;  %v1982_v28 = vor.u32 %v2443_v20, %v1979_v21  ;;  %v1775_v31 = vld [vmem:[%s3751_s1 + $0xfc] sm:$0xf0] }
  0x42   :  { %1390 = vmatpush.bf16.msra.mxu3 %v1706_v13  ;;  %v1895_v13 = vld [vmem:[%s3751_s1 + $0x1ec] sm:$0xf0]  ;;  %v1967_v35 = vld [vmem:[%s3751_s1 + $0x27c] sm:$0xf0]  ;;  %v2473_v38 = vld [vmem:[%s3751_s1 + $0x37c] sm:$0xf]  ;;  %v1778_v40 = vor.u32 %v2392_v29, %v1775_v31 }
  0x43   :  { %1355 = vmatpush.bf16.msrb.mxu1 %v2134_v34  ;;  %1343 = vmatmul.bf16.vlgmr.msrb.gmra.mxu0 %v3054_v41  ;;  %v1898_v22 = vor.u32 %v2422_v12, %v1895_v13  ;;  %v2440_v34 = vld [vmem:[%s3751_s1 + $0x274] sm:$0xf]  ;;  %v2099_v39 = vld [vmem:[%s3751_s1 + $0x384] sm:$0xf0]  ;;  %v1871_v45 = vld [vmem:[%s3751_s1 + $0x1bc] sm:$0xf0] }
  0x44   :  { %1400 = vmatpush.bf16.msra.mxu0 %v1838_v24  ;;  %1369 = vmatmul.bf16.vlgmr.msrb.gmra.mxu2 %v3056_v43  ;;  %v2111_v24 = vld [vmem:[%s3751_s1 + $0x39c] sm:$0xf0]  ;;  %v2389_v50 = vld [vmem:[%s3751_s1 + $0xdc] sm:$0xf]  ;;  %v1763_v51 = vld [vmem:[%s3751_s1 + $0xe4] sm:$0xf0] }
  0x45   :  { %1426 = vmatpush.bf16.msra.mxu2 %v2030_v27  ;;  %v1883_v27 = vld [vmem:[%s3751_s1 + $0x1d4] sm:$0xf0]  ;;  %v1955_v16 = vld [vmem:[%s3751_s1 + $0x264] sm:$0xf0]  ;;  %v2470_v55 = vld [vmem:[%s3751_s1 + $0x364] sm:$0xf]  ;;  %v1766_v57 = vor.u32 %v2389_v50, %v1763_v51 }
  0x46   :  { %1391 = vmatpush.bf16.msra.mxu3 %v1694_v32  ;;  %1356 = vmatmul.bf16.vlgmr.msrb.gmra.mxu1 %v3058_v47  ;;  %v2114_v32 = vor.u32 %v2476_v23, %v2111_v24  ;;  %v1886_v37 = vor.u32 %v2419_v26, %v1883_v27  ;;  %v2087_v56 = vld [vmem:[%s3751_s1 + $0x36c] sm:$0xf0]  ;;  %v2413_v58 = vld [vmem:[%s3751_s1 + $0x19c] sm:$0xf]  ;;  %v1859_v59 = vld [vmem:[%s3751_s1 + $0x1a4] sm:$0xf0] }
  0x47   :  { %1413 = vmatpush.bf16.msra.mxu1 %v1934_v44  ;;  %v2416_v44 = vld [vmem:[%s3751_s1 + $0x1b4] sm:$0xf]  ;;  %v1751_v62 = vld [vmem:[%s3751_s1 + $0xcc] sm:$0xf0]  ;;  %v2434_v63 = vld [vmem:[%s3751_s1 + $0x244] sm:$0xf]  ;;  %v1862_v5 = vor.u32 %v2413_v58, %v1859_v59 }
  0x48   :  { %1401 = vmatpush.bf16.msra.mxu0 %v1826_v49  ;;  %v1970_v49 = vor.u32 %v2440_v34, %v1967_v35  ;;  %v1874_v54 = vor.u32 %v2416_v44, %v1871_v45  ;;  %v1943_v2 = vld [vmem:[%s3751_s1 + $0x24c] sm:$0xf0]  ;;  %v2503_v3 = vld [vmem:[%s3751_s1 + $0x46c] sm:$0xf]  ;;  %v2219_v4 = vld [vmem:[%s3751_s1 + $0x474] sm:$0xf0] }
  0x49   :  { %1427 = vmatpush.bf16.msra.mxu2 %v2018_v53  ;;  %v2437_v53 = vld [vmem:[%s3751_s1 + $0x25c] sm:$0xf]  ;;  %v2467_v6 = vld [vmem:[%s3751_s1 + $0x34c] sm:$0xf]  ;;  %v2075_v7 = vld [vmem:[%s3751_s1 + $0x354] sm:$0xf0]  ;;  %v2222_v12 = vor.u32 %v2503_v3, %v2219_v4 }
  0x4a   :  { %1392 = vmatpush.bf16.msra.mxu3 %v1682_v52  ;;  %v2102_v52 = vor.u32 %v2473_v38, %v2099_v39  ;;  %v2410_v9 = vld [vmem:[%s3751_s1 + $0x184] sm:$0xf]  ;;  %v1847_v10 = vld [vmem:[%s3751_s1 + $0x18c] sm:$0xf0]  ;;  %v2078_v17 = vor.u32 %v2467_v6, %v2075_v7  ;;  %v2464_v18 = vld [vmem:[%s3751_s1 + $0x334] sm:$0xf] }
  0x4b   :  { %1414 = vmatpush.bf16.msra.mxu1 %v1922_v60  ;;  %v1958_v60 = vor.u32 %v2437_v53, %v1955_v16  ;;  %v2207_v20 = vld [vmem:[%s3751_s1 + $0x45c] sm:$0xf0]  ;;  %v1850_v21 = vor.u32 %v2410_v9, %v1847_v10  ;;  %v2536_v23 = vld [vmem:[%s3751_s1 + $0x574] sm:$0xf]  ;;  %v2497_v34 = vld [vmem:[%s3751_s1 + $0x43c] sm:$0xf] }
  0x4c   :  { %1402 = vmatpush.bf16.msra.mxu0 %v1814_v61  ;;  %v2386_v61 = vld [vmem:[%s3751_s1 + $0xc4] sm:$0xf]  ;;  %v2351_v24 = vld [vmem:[%s3751_s1 + $0x57c] sm:$0xf0]  ;;  %v2524_v27 = vld [vmem:[%s3751_s1 + $0x514] sm:$0xf] }
  0x4d   :  { %1428 = vmatpush.bf16.msra.mxu2 %v2006_v1  ;;  %v2090_v1 = vor.u32 %v2470_v55, %v2087_v56  ;;  %v2354_v31 = vor.u32 %v2536_v23, %v2351_v24  ;;  %v2195_v35 = vld [vmem:[%s3751_s1 + $0x444] sm:$0xf0]  ;;  %v2533_v38 = vld [vmem:[%s3751_s1 + $0x55c] sm:$0xf]  ;;  %v2494_v53 = vld [vmem:[%s3751_s1 + $0x424] sm:$0xf] }
  0x4e   :  { %1393 = vmatpush.bf16.msra.mxu3 %v1670_v0  ;;  %v1090_v0 = vpack.c.b16 %v910_v46, %v910_v46  ;;  %v2339_v39 = vld [vmem:[%s3751_s1 + $0x564] sm:$0xf0]  ;;  %v2198_v44 = vor.u32 %v2497_v34, %v2195_v35  ;;  %v2521_v45 = vld [vmem:[%s3751_s1 + $0x4fc] sm:$0xf]  ;;  %v2183_v16 = vld [vmem:[%s3751_s1 + $0x42c] sm:$0xf0] }
  0x4f   :  { %1415 = vmatpush.bf16.msra.mxu1 %v1910_v8  ;;  %v1754_v8 = vor.u32 %v2386_v61, %v1751_v62  ;;  %v2291_v46 = vld [vmem:[%s3751_s1 + $0x504] sm:$0xf0]  ;;  %v2342_v51 = vor.u32 %v2533_v38, %v2339_v39  ;;  %v2327_v55 = vld [vmem:[%s3751_s1 + $0x54c] sm:$0xf0]  ;;  %v2385_v58 = vld [vmem:[%s3751_s1 + $0xb8] sm:$0xf0]  ;;  %v2186_v61 = vor.u32 %v2494_v53, %v2183_v16 }
  0x50   :  { %1403 = vmatpush.bf16.msra.mxu0 %v1802_v11  ;;  %v1946_v11 = vor.u32 %v2434_v63, %v1943_v2  ;;  %v1278_v13 = vsel %vm1273_vm0, %v1090_v0, 0  ;;  %v1745_v56 = vld [vmem:[%s3751_s1 + $0xb0] sm:$0xf]  ;;  %v2518_v62 = vld [vmem:[%s3751_s1 + $0x4e4] sm:$0xf] }
  0x51   :  { %1429 = vmatpush.bf16.msra.mxu2 %v1994_v15  ;;  %v2315_v15 = vld [vmem:[%s3751_s1 + $0x534] sm:$0xf0]  ;;  %v1841_v59 = vld [vmem:[%s3751_s1 + $0x170] sm:$0xf]  ;;  %v2491_v2 = vld [vmem:[%s3751_s1 + $0x40c] sm:$0xf]  ;;  %v1746_v4 = vor.u32 %v2385_v58, %v1745_v56 }
  0x52   :  { %1394 = vmatpush.bf16.msra.mxu3 %v1658_v14  ;;  %v2527_v14 = vld [vmem:[%s3751_s1 + $0x52c] sm:$0xf]  ;;  %v2279_v63 = vld [vmem:[%s3751_s1 + $0x4ec] sm:$0xf0]  ;;  %v2171_v3 = vld [vmem:[%s3751_s1 + $0x414] sm:$0xf0] }
  0x53   :  { %1416 = vmatpush.bf16.msra.mxu1 %v1898_v22  ;;  %v2063_v22 = vld [vmem:[%s3751_s1 + $0x33c] sm:$0xf0]  ;;  %v1733_v6 = vld [vmem:[%s3751_s1 + $0x98] sm:$0xf]  ;;  %v2282_v7 = vor.u32 %v2518_v62, %v2279_v63  ;;  %v2406_v10 = vld [vmem:[%s3751_s1 + $0x160] sm:$0xf0] }
  0x54   :  { %1404 = vmatpush.bf16.msra.mxu0 %v1790_v25  ;;  %v2318_v25 = vor.u32 %v2527_v14, %v2315_v15  ;;  %v2066_v29 = vor.u32 %v2464_v18, %v2063_v22  ;;  %v1829_v9 = vld [vmem:[%s3751_s1 + $0x158] sm:$0xf]  ;;  %v2488_v14 = vld [vmem:[%s3751_s1 + $0x3f4] sm:$0xf]  ;;  %v2159_v15 = vld [vmem:[%s3751_s1 + $0x3fc] sm:$0xf0] }
  0x55   :  { %1430 = vmatpush.bf16.msra.mxu2 %v1982_v28  ;;  %1395 = vmatmul.bf16.vlgmr.msra.gmra.mxu3 %v2915_v33  ;;  %v2303_v28 = vld [vmem:[%s3751_s1 + $0x51c] sm:$0xf0]  ;;  %v1830_v18 = vor.u32 %v2406_v10, %v1829_v9  ;;  %v2403_v23 = vld [vmem:[%s3751_s1 + $0x148] sm:$0xf0]  ;;  %v2162_v24 = vor.u32 %v2488_v14, %v2159_v15  ;;  %v2376_v35 = vld [vmem:[%s3751_s1 + $0x70] sm:$0xf0] }
  0x56   :  { %1439 = vmatpush.bf16.msrb.mxu3 %v2126_v19  ;;  %v2500_v19 = vld [vmem:[%s3751_s1 + $0x454] sm:$0xf]  ;;  %v1817_v22 = vld [vmem:[%s3751_s1 + $0x140] sm:$0xf]  ;;  %v2433_v53 = vld [vmem:[%s3751_s1 + $0x238] sm:$0xf0] }
  0x57   :  { %1417 = vmatpush.bf16.msra.mxu1 %v1886_v37  ;;  %v2210_v26 = vor.u32 %v2500_v19, %v2207_v20  ;;  %v2051_v37 = vld [vmem:[%s3751_s1 + $0x324] sm:$0xf0]  ;;  %v1721_v19 = vld [vmem:[%s3751_s1 + $0x80] sm:$0xf]  ;;  %v2400_v38 = vld [vmem:[%s3751_s1 + $0x130] sm:$0xf0] }
  0x58   :  { %1405 = vmatpush.bf16.msra.mxu0 %v1778_v40  ;;  %v2306_v40 = vor.u32 %v2524_v27, %v2303_v28  ;;  %v2485_v27 = vld [vmem:[%s3751_s1 + $0x3dc] sm:$0xf]  ;;  %v2147_v28 = vld [vmem:[%s3751_s1 + $0x3e4] sm:$0xf0]  ;;  %v2506_v58 = vld [vmem:[%s3751_s1 + $0x484] sm:$0xf] }
  0x59   :  { %1431 = vmatpush.bf16.msra.mxu2 %v1970_v49  ;;  %v2458_v49 = vld [vmem:[%s3751_s1 + $0x304] sm:$0xf]  ;;  %v2150_v39 = vor.u32 %v2485_v27, %v2147_v28  ;;  %v2397_v56 = vld [vmem:[%s3751_s1 + $0x118] sm:$0xf0]  ;;  %v2021_v10 = vld [vmem:[%s3751_s1 + $0x2d8] sm:$0xf] }
  0x5a   :  { %1440 = vmatpush.bf16.msrb.mxu3 %v2114_v32  ;;  %v2461_v32 = vld [vmem:[%s3751_s1 + $0x31c] sm:$0xf]  ;;  %v2427_v14 = vld [vmem:[%s3751_s1 + $0x208] sm:$0xf0]  ;;  %v1901_v27 = vld [vmem:[%s3751_s1 + $0x1e8] sm:$0xf] }
  0x5b   :  { %1418 = vmatpush.bf16.msra.mxu1 %v1874_v54  ;;  %v2054_v50 = vor.u32 %v2461_v32, %v2051_v37  ;;  %v2530_v54 = vld [vmem:[%s3751_s1 + $0x544] sm:$0xf]  ;;  %v1709_v32 = vld [vmem:[%s3751_s1 + $0x68] sm:$0xf]  ;;  %v2457_v62 = vld [vmem:[%s3751_s1 + $0x2f8] sm:$0xf0] }
  0x5c   :  { %1406 = vmatpush.bf16.msra.mxu0 %v1766_v57  ;;  %v2294_v57 = vor.u32 %v2521_v45, %v2291_v46  ;;  %v1805_v37 = vld [vmem:[%s3751_s1 + $0x128] sm:$0xf]  ;;  %v2482_v45 = vld [vmem:[%s3751_s1 + $0x3c4] sm:$0xf]  ;;  %v2135_v46 = vld [vmem:[%s3751_s1 + $0x3cc] sm:$0xf0] }
  0x5d   :  { %1432 = vmatpush.bf16.msra.mxu2 %v1958_v60  ;;  %v2409_v60 = vld [vmem:[%s3751_s1 + $0x178] sm:$0xf0]  ;;  %v2424_v28 = vld [vmem:[%s3751_s1 + $0x1f0] sm:$0xf0] }
  0x5e   :  { %1441 = vmatpush.bf16.msrb.mxu3 %v2102_v52  ;;  %v2039_v52 = vld [vmem:[%s3751_s1 + $0x30c] sm:$0xf0] }
  0x5f   :  { %1419 = vmatpush.bf16.msra.mxu1 %v1862_v5  ;;  %v2042_v0 = vor.u32 %v2458_v49, %v2039_v52  ;;  %v1842_v5 = vor.u32 %v2409_v60, %v1841_v59  ;;  %v1710_v49 = vor.u32 %v2376_v35, %v1709_v32  ;;  %v1937_v52 = vld [vmem:[%s3751_s1 + $0x230] sm:$0xf]  ;;  %v1757_v32 = vld [vmem:[%s3751_s1 + $0xc8] sm:$0xf] }
  0x60   :  { %1407 = vmatpush.bf16.msra.mxu0 %v1754_v8  ;;  %v2382_v8 = vld [vmem:[%s3751_s1 + $0xa0] sm:$0xf0]  ;;  %v2231_v59 = vld [vmem:[%s3751_s1 + $0x48c] sm:$0xf0]  ;;  %v1938_v60 = vor.u32 %v2433_v53, %v1937_v52 }
  0x61   :  { %1433 = vmatpush.bf16.msra.mxu2 %v1946_v11  ;;  %v2174_v11 = vor.u32 %v2491_v2, %v2171_v3  ;;  %v2430_v2 = vld [vmem:[%s3751_s1 + $0x220] sm:$0xf0]  ;;  %v2234_v3 = vor.u32 %v2506_v58, %v2231_v59  ;;  %v2129_v35 = vld [vmem:[%s3751_s1 + $0x3b0] sm:$0xf] }
  0x62   :  { %1442 = vmatpush.bf16.msrb.mxu3 %v2090_v1  ;;  %v2330_v1 = vor.u32 %v2530_v54, %v2327_v55  ;;  %v2373_v54 = vld [vmem:[%s3751_s1 + $0x58] sm:$0xf0]  ;;  %v1793_v55 = vld [vmem:[%s3751_s1 + $0x110] sm:$0xf]  ;;  %v2502_v59 = vld [vmem:[%s3751_s1 + $0x460] sm:$0xf0] }
  0x63   :  { %1420 = vmatpush.bf16.msra.mxu1 %v1850_v21  ;;  %1408 = vmatmul.bf16.vlgmr.msra.gmra.mxu0 %v2929_v42  ;;  %v2379_v21 = vld [vmem:[%s3751_s1 + $0x88] sm:$0xf0] }
  0x64   :  { %1452 = vmatpush.bf16.msrb.mxu0 %v2222_v12  ;;  %1434 = vmatmul.bf16.vlgmr.msra.gmra.mxu2 %v2913_v30  ;;  %v2515_v12 = vld [vmem:[%s3751_s1 + $0x4cc] sm:$0xf] }
  0x65   :  { %1482 = vmatpush.bf16.msrb.mxu2 %v1278_v13  ;;  %v2267_v13 = vld [vmem:[%s3751_s1 + $0x4d4] sm:$0xf0] }
  0x66   :  { %1443 = vmatpush.bf16.msrb.mxu3 %v2078_v17  ;;  %1421 = vmatmul.bf16.vlgmr.msra.gmra.mxu1 %v2917_v36  ;;  %v1734_v17 = vor.u32 %v2382_v8, %v1733_v6  ;;  %v2270_v20 = vor.u32 %v2515_v12, %v2267_v13  ;;  %v1781_v6 = vld [vmem:[%s3751_s1 + $0xf8] sm:$0xf]  ;;  %v1913_v13 = vld [vmem:[%s3751_s1 + $0x200] sm:$0xf] }
  0x67   :  { %1465 = vmatpush.bf16.msrb.mxu1 %v2318_v25  ;;  %v2512_v25 = vld [vmem:[%s3751_s1 + $0x4b4] sm:$0xf] }
  0x68   :  { %1453 = vmatpush.bf16.msrb.mxu0 %v2210_v26  ;;  %v2255_v26 = vld [vmem:[%s3751_s1 + $0x4bc] sm:$0xf0] }
  0x69   :  { %1483 = vmatpush.bf16.msrb.mxu2 %v2354_v31  ;;  %v1818_v31 = vor.u32 %v2403_v23, %v1817_v22  ;;  %v2258_v34 = vor.u32 %v2512_v25, %v2255_v26  ;;  %v1914_v22 = vor.u32 %v2427_v14, %v1913_v13  ;;  %v2009_v23 = vld [vmem:[%s3751_s1 + $0x2c0] sm:$0xf]  ;;  %v1661_v26 = vld [vmem:[%s3751_s1 + $0x8] sm:$0xf] }
  0x6a   :  { %1444 = vmatpush.bf16.msrb.mxu3 %v2066_v29  ;;  %v1722_v29 = vor.u32 %v2379_v21, %v1721_v19  ;;  %v1769_v19 = vld [vmem:[%s3751_s1 + $0xe0] sm:$0xf]  ;;  %v2093_v14 = vld [vmem:[%s3751_s1 + $0x368] sm:$0xf] }
  0x6b   :  { %1466 = vmatpush.bf16.msrb.mxu1 %v2306_v40  ;;  %v2509_v40 = vld [vmem:[%s3751_s1 + $0x49c] sm:$0xf] }
  0x6c   :  { %1454 = vmatpush.bf16.msrb.mxu0 %v2198_v44  ;;  %v2243_v44 = vld [vmem:[%s3751_s1 + $0x4a4] sm:$0xf0] }
  0x6d   :  { %1484 = vmatpush.bf16.msrb.mxu2 %v2342_v51  ;;  %v1697_v51 = vld [vmem:[%s3751_s1 + $0x50] sm:$0xf]  ;;  %v2246_v16 = vor.u32 %v2509_v40, %v2243_v44  ;;  %v1902_v40 = vor.u32 %v2424_v28, %v1901_v27  ;;  %v2505_v44 = vld [vmem:[%s3751_s1 + $0x478] sm:$0xf0] }
  0x6e   :  { %1445 = vmatpush.bf16.msrb.mxu3 %v2054_v50  ;;  %v1806_v50 = vor.u32 %v2400_v38, %v1805_v37  ;;  %v1698_v63 = vor.u32 %v2373_v54, %v1697_v51  ;;  %v2481_v37 = vld [vmem:[%s3751_s1 + $0x3b8] sm:$0xf0]  ;;  %v2225_v38 = vld [vmem:[%s3751_s1 + $0x470] sm:$0xf]  ;;  %v2117_v54 = vld [vmem:[%s3751_s1 + $0x398] sm:$0xf] }
  0x6f   :  { %1467 = vmatpush.bf16.msrb.mxu1 %v2294_v57  ;;  %v2138_v57 = vor.u32 %v2482_v45, %v2135_v46  ;;  %v1997_v45 = vld [vmem:[%s3751_s1 + $0x2a8] sm:$0xf]  ;;  %v2448_v46 = vld [vmem:[%s3751_s1 + $0x2b0] sm:$0xf0]  ;;  %v2421_v51 = vld [vmem:[%s3751_s1 + $0x1d8] sm:$0xf0]  ;;  %v2130_v53 = vor.u32 %v2481_v37, %v2129_v35 }
  0x70   :  { %1455 = vmatpush.bf16.msrb.mxu0 %v2186_v61  ;;  %v2033_v61 = vld [vmem:[%s3751_s1 + $0x2f0] sm:$0xf]  ;;  %v2529_v27 = vld [vmem:[%s3751_s1 + $0x538] sm:$0xf0] }
  0x71   :  { %1485 = vmatpush.bf16.msrb.mxu2 %v2330_v1  ;;  %v1925_v1 = vld [vmem:[%s3751_s1 + $0x218] sm:$0xf]  ;;  %v2034_v8 = vor.u32 %v2457_v62, %v2033_v61  ;;  %v2445_v61 = vld [vmem:[%s3751_s1 + $0x298] sm:$0xf0] }
  0x72   :  { %1446 = vmatpush.bf16.msrb.mxu3 %v2042_v0  ;;  %v1794_v0 = vor.u32 %v2397_v56, %v1793_v55  ;;  %v1926_v9 = vor.u32 %v2430_v2, %v1925_v1  ;;  %v2478_v55 = vld [vmem:[%s3751_s1 + $0x3a0] sm:$0xf0]  ;;  %v2213_v56 = vld [vmem:[%s3751_s1 + $0x458] sm:$0xf]  ;;  %v2105_v2 = vld [vmem:[%s3751_s1 + $0x380] sm:$0xf] }
  0x73   :  { %1468 = vmatpush.bf16.msrb.mxu1 %v2282_v7  ;;  %v2394_v7 = vld [vmem:[%s3751_s1 + $0x100] sm:$0xf0]  ;;  %v1877_v62 = vld [vmem:[%s3751_s1 + $0x1b8] sm:$0xf]  ;;  %v2214_v1 = vor.u32 %v2502_v59, %v2213_v56  ;;  %v2493_v37 = vld [vmem:[%s3751_s1 + $0x418] sm:$0xf0] }
  0x74   :  { %1456 = vmatpush.bf16.msrb.mxu0 %v2174_v11  ;;  %2360 = vmatmul.msk.bf16.vlgmr.msrb.gmra.mxu2 %vm1269_vm1, %v3060_v48  ;;  %v2454_v11 = vld [vmem:[%s3751_s1 + $0x2e0] sm:$0xf0]  ;;  %v1782_v15 = vor.u32 %v2394_v7, %v1781_v6  ;;  %v2499_v7 = vld [vmem:[%s3751_s1 + $0x448] sm:$0xf0] }
  0x75   :  { %1491 = vmatpush.bf16.msra.mxu2 %v1746_v4  ;;  %1447 = vmatmul.bf16.vlgmr.msrb.gmra.mxu3 %v3054_v41  ;;  %v1685_v4 = vld [vmem:[%s3751_s1 + $0x38] sm:$0xf]  ;;  %v2022_v21 = vor.u32 %v2454_v11, %v2021_v10  ;;  %v1865_v10 = vld [vmem:[%s3751_s1 + $0x1a0] sm:$0xf]  ;;  %v2415_v11 = vld [vmem:[%s3751_s1 + $0x1a8] sm:$0xf0] }
  0x76   :  { %1504 = vmatpush.bf16.msra.mxu3 %v1842_v5  ;;  %v2370_v5 = vld [vmem:[%s3751_s1 + $0x40] sm:$0xf0] }
  0x77   :  { %1469 = vmatpush.bf16.msrb.mxu1 %v2270_v20  ;;  %v1686_v12 = vor.u32 %v2370_v5, %v1685_v4  ;;  %v2391_v20 = vld [vmem:[%s3751_s1 + $0xe8] sm:$0xf0]  ;;  %v2201_v4 = vld [vmem:[%s3751_s1 + $0x440] sm:$0xf] }
  0x78   :  { %1457 = vmatpush.bf16.msrb.mxu0 %v2162_v24  ;;  %v2451_v24 = vld [vmem:[%s3751_s1 + $0x2c8] sm:$0xf0]  ;;  %v2202_v13 = vor.u32 %v2499_v7, %v2201_v4  ;;  %v2285_v7 = vld [vmem:[%s3751_s1 + $0x4e8] sm:$0xf] }
  0x79   :  { %1492 = vmatpush.bf16.msra.mxu2 %v1734_v17  ;;  %v1673_v17 = vld [vmem:[%s3751_s1 + $0x20] sm:$0xf] }
  0x7a   :  { %1505 = vmatpush.bf16.msra.mxu3 %v1830_v18  ;;  %v2367_v18 = vld [vmem:[%s3751_s1 + $0x28] sm:$0xf0] }
  0x7b   :  { %1470 = vmatpush.bf16.msrb.mxu1 %v2258_v34  ;;  %v1674_v25 = vor.u32 %v2367_v18, %v1673_v17  ;;  %v2388_v34 = vld [vmem:[%s3751_s1 + $0xd0] sm:$0xf0]  ;;  %v1866_v18 = vor.u32 %v2415_v11, %v1865_v10  ;;  %v2045_v10 = vld [vmem:[%s3751_s1 + $0x308] sm:$0xf] }
  0x7c   :  { %1458 = vmatpush.bf16.msrb.mxu0 %v2150_v39  ;;  %v2010_v39 = vor.u32 %v2451_v24, %v2009_v23  ;;  %v1758_v52 = vor.u32 %v2388_v34, %v1757_v32  ;;  %v2412_v23 = vld [vmem:[%s3751_s1 + $0x190] sm:$0xf0]  ;;  %v2177_v32 = vld [vmem:[%s3751_s1 + $0x410] sm:$0xf] }
  0x7d   :  { %1493 = vmatpush.bf16.msra.mxu2 %v1722_v29  ;;  %v1770_v29 = vor.u32 %v2391_v20, %v1769_v19  ;;  %v2496_v19 = vld [vmem:[%s3751_s1 + $0x430] sm:$0xf0]  ;;  %v1961_v20 = vld [vmem:[%s3751_s1 + $0x260] sm:$0xf] }
  0x7e   :  { %1506 = vmatpush.bf16.msra.mxu3 %v1818_v31  ;;  %v2364_v31 = vld [vmem:[%s3751_s1 + $0x10] sm:$0xf0] }
  0x7f   :  { %1471 = vmatpush.bf16.msrb.mxu1 %v2246_v16  ;;  %v2226_v16 = vor.u32 %v2505_v44, %v2225_v38  ;;  %v1949_v38 = vld [vmem:[%s3751_s1 + $0x248] sm:$0xf]  ;;  %v2460_v11 = vld [vmem:[%s3751_s1 + $0x310] sm:$0xf0] }
  0x80   :  { %1459 = vmatpush.bf16.msrb.mxu0 %v2138_v57  ;;  %v1998_v57 = vor.u32 %v2448_v46, %v1997_v45  ;;  %v2309_v46 = vld [vmem:[%s3751_s1 + $0x518] sm:$0xf] }
  0x81   :  { %1494 = vmatpush.bf16.msra.mxu2 %v1710_v49  ;;  %v1662_v49 = vor.u32 %v2364_v31, %v1661_v26  ;;  %v2321_v26 = vld [vmem:[%s3751_s1 + $0x530] sm:$0xf]  ;;  %v2469_v31 = vld [vmem:[%s3751_s1 + $0x358] sm:$0xf0] }
  0x82   :  { %1507 = vmatpush.bf16.msra.mxu3 %v1806_v50  ;;  %v1889_v50 = vld [vmem:[%s3751_s1 + $0x1d0] sm:$0xf] }
  0x83   :  { %1472 = vmatpush.bf16.msrb.mxu1 %v2234_v3  ;;  %1460 = vmatmul.bf16.vlgmr.msrb.gmra.mxu0 %v3058_v47  ;;  %v1890_v58 = vor.u32 %v2421_v51, %v1889_v50  ;;  %v2475_v3 = vld [vmem:[%s3751_s1 + $0x388] sm:$0xf0]  ;;  %v2178_v50 = vor.u32 %v2493_v37, %v2177_v32  ;;  %v2069_v51 = vld [vmem:[%s3751_s1 + $0x338] sm:$0xf] }
  0x84   :  { %1517 = vmatpush.bf16.msra.mxu0 %v1938_v60  ;;  %v1985_v60 = vld [vmem:[%s3751_s1 + $0x290] sm:$0xf] }
  0x85   :  { %1495 = vmatpush.bf16.msra.mxu2 %v1698_v63  ;;  %v2418_v63 = vld [vmem:[%s3751_s1 + $0x1c0] sm:$0xf0]  ;;  %v1986_v5 = vor.u32 %v2445_v61, %v1985_v60  ;;  %v2297_v60 = vld [vmem:[%s3751_s1 + $0x500] sm:$0xf]  ;;  %v2523_v61 = vld [vmem:[%s3751_s1 + $0x508] sm:$0xf0] }
  0x86   :  { %1508 = vmatpush.bf16.msra.mxu3 %v1794_v0  ;;  %1473 = vmatmul.bf16.vlgmr.msrb.gmra.mxu1 %v3056_v43  ;;  %v2118_v0 = vor.u32 %v2478_v55, %v2117_v54  ;;  %v1878_v6 = vor.u32 %v2418_v63, %v1877_v62  ;;  %v2490_v54 = vld [vmem:[%s3751_s1 + $0x400] sm:$0xf0]  ;;  %v2057_v63 = vld [vmem:[%s3751_s1 + $0x320] sm:$0xf]  ;;  %v2298_v4 = vor.u32 %v2523_v61, %v2297_v60 }
  0x87   :  { %1530 = vmatpush.bf16.msra.mxu1 %v2034_v8  ;;  %v1973_v8 = vld [vmem:[%s3751_s1 + $0x278] sm:$0xf] }
  0x88   :  { %1518 = vmatpush.bf16.msra.mxu0 %v1926_v9  ;;  %v2442_v9 = vld [vmem:[%s3751_s1 + $0x280] sm:$0xf0] }
  0x89   :  { %1496 = vmatpush.bf16.msra.mxu2 %v1686_v12  ;;  %v308_v12 = vld [vmem:[%s3751_s1 + $0x590] sm:$0xf]  ;;  %v1974_v17 = vor.u32 %v2442_v9, %v1973_v8  ;;  %v2520_v8 = vld [vmem:[%s3751_s1 + $0x4f0] sm:$0xf0] }
  0x8a   :  { %1509 = vmatpush.bf16.msra.mxu3 %v1782_v15  ;;  %v2472_v15 = vld [vmem:[%s3751_s1 + $0x370] sm:$0xf0]  ;;  %v911_v24 = vunpack.c.l.b16 %v308_v12 }
  0x8b   :  { %1531 = vmatpush.bf16.msra.mxu1 %v2022_v21  ;;  %v2439_v21 = vld [vmem:[%s3751_s1 + $0x268] sm:$0xf0] }
  0x8c   :  { %1519 = vmatpush.bf16.msra.mxu0 %v1914_v22  ;;  %v1853_v22 = vld [vmem:[%s3751_s1 + $0x188] sm:$0xf]  ;;  %v1962_v34 = vor.u32 %v2439_v21, %v1961_v20  ;;  %v1091_v44 = vpack.c.b16 %v911_v24, %v911_v24 }
  0x8d   :  { %1497 = vmatpush.bf16.msra.mxu2 %v1674_v25  ;;  %v2094_v25 = vor.u32 %v2472_v15, %v2093_v14  ;;  %v1854_v35 = vor.u32 %v2412_v23, %v1853_v22  ;;  %v2333_v14 = vld [vmem:[%s3751_s1 + $0x548] sm:$0xf]  ;;  %v2532_v15 = vld [vmem:[%s3751_s1 + $0x550] sm:$0xf0]  ;;  %v2261_v22 = vld [vmem:[%s3751_s1 + $0x4b8] sm:$0xf] }
  0x8e   :  { %1510 = vmatpush.bf16.msra.mxu3 %v1770_v29  ;;  %v2081_v29 = vld [vmem:[%s3751_s1 + $0x350] sm:$0xf]  ;;  %v1281_v56 = vsel %vm1273_vm0, %v1091_v44, 0  ;;  %v2334_v20 = vor.u32 %v2532_v15, %v2333_v14  ;;  %v2514_v23 = vld [vmem:[%s3751_s1 + $0x4c0] sm:$0xf0] }
  0x8f   :  { %1532 = vmatpush.bf16.msra.mxu1 %v2010_v39  ;;  %v2436_v39 = vld [vmem:[%s3751_s1 + $0x250] sm:$0xf0]  ;;  %v2082_v45 = vor.u32 %v2469_v31, %v2081_v29  ;;  %v2262_v24 = vor.u32 %v2514_v23, %v2261_v22  ;;  %v2237_v29 = vld [vmem:[%s3751_s1 + $0x488] sm:$0xf] }
  0x90   :  { %1520 = vmatpush.bf16.msra.mxu0 %v1902_v40  ;;  %v2322_v40 = vor.u32 %v2529_v27, %v2321_v26  ;;  %v2249_v26 = vld [vmem:[%s3751_s1 + $0x4a0] sm:$0xf]  ;;  %v2511_v27 = vld [vmem:[%s3751_s1 + $0x4a8] sm:$0xf0] }
  0x91   :  { %1498 = vmatpush.bf16.msra.mxu2 %v1662_v49  ;;  %v2526_v49 = vld [vmem:[%s3751_s1 + $0x520] sm:$0xf0] }
  0x92   :  { %1511 = vmatpush.bf16.msra.mxu3 %v1758_v52  ;;  %v2466_v52 = vld [vmem:[%s3751_s1 + $0x340] sm:$0xf0]  ;;  %v2310_v55 = vor.u32 %v2526_v49, %v2309_v46 }
  0x93   :  { %1533 = vmatpush.bf16.msra.mxu1 %v1998_v57  ;;  %v2357_v57 = vld [vmem:[%s3751_s1 + $0x578] sm:$0xf]  ;;  %v2070_v59 = vor.u32 %v2466_v52, %v2069_v51 }
  0x94   :  { %1521 = vmatpush.bf16.msra.mxu0 %v1890_v58  ;;  %1499 = vmatmul.bf16.vlgmr.msra.gmra.mxu2 %v2915_v33  ;;  %v2106_v33 = vor.u32 %v2475_v3, %v2105_v2  ;;  %v2538_v58 = vld [vmem:[%s3751_s1 + $0x580] sm:$0xf0]  ;;  %v2487_v2 = vld [vmem:[%s3751_s1 + $0x3e8] sm:$0xf0] }
  0x95   :  { %1543 = vmatpush.bf16.msrb.mxu2 %v2130_v53  ;;  %1512 = vmatmul.bf16.vlgmr.msra.gmra.mxu3 %v2929_v42  ;;  %v2189_v42 = vld [vmem:[%s3751_s1 + $0x428] sm:$0xf]  ;;  %v1950_v53 = vor.u32 %v2436_v39, %v1949_v38  ;;  %v2358_v3 = vor.u32 %v2538_v58, %v2357_v57 }
  0x96   :  { %1556 = vmatpush.bf16.msrb.mxu3 %v2226_v16  ;;  %v2190_v28 = vor.u32 %v2496_v19, %v2189_v42  ;;  %v2165_v16 = vld [vmem:[%s3751_s1 + $0x3f8] sm:$0xf]  ;;  %v2046_v42 = vor.u32 %v2460_v11, %v2045_v10 }
  0x97   :  { %1534 = vmatpush.bf16.msra.mxu1 %v1986_v5  ;;  %v2166_v62 = vor.u32 %v2490_v54, %v2165_v16  ;;  %v2345_v5 = vld [vmem:[%s3751_s1 + $0x560] sm:$0xf] }
  0x98   :  { %1522 = vmatpush.bf16.msra.mxu0 %v1878_v6 }
  0x99   :  { %1544 = vmatpush.bf16.msrb.mxu2 %v2118_v0  ;;  %v2463_v0 = vld [vmem:[%s3751_s1 + $0x328] sm:$0xf0] }
  0x9a   :  { %1557 = vmatpush.bf16.msrb.mxu3 %v2214_v1  ;;  %v2153_v1 = vld [vmem:[%s3751_s1 + $0x3e0] sm:$0xf]  ;;  %v2058_v6 = vor.u32 %v2463_v0, %v2057_v63 }
  0x9b   :  { %1535 = vmatpush.bf16.msra.mxu1 %v1974_v17  ;;  %v2154_v9 = vor.u32 %v2487_v2, %v2153_v1  ;;  %v2273_v17 = vld [vmem:[%s3751_s1 + $0x4d0] sm:$0xf] }
  0x9c   :  { %1523 = vmatpush.bf16.msra.mxu0 %v1866_v18  ;;  %v2517_v18 = vld [vmem:[%s3751_s1 + $0x4d8] sm:$0xf0] }
  0x9d   :  { %1545 = vmatpush.bf16.msrb.mxu2 %v2106_v33  ;;  %v2484_v33 = vld [vmem:[%s3751_s1 + $0x3d0] sm:$0xf0]  ;;  %v2274_v21 = vor.u32 %v2517_v18, %v2273_v17 }
  0x9e   :  { %1558 = vmatpush.bf16.msrb.mxu3 %v2202_v13  ;;  %v2286_v13 = vor.u32 %v2520_v8, %v2285_v7 }
  0x9f   :  { %1536 = vmatpush.bf16.msra.mxu1 %v1962_v34 }
  0xa0   :  { %1524 = vmatpush.bf16.msra.mxu0 %v1854_v35 }
  0xa1   :  { %1546 = vmatpush.bf16.msrb.mxu2 %v2094_v25  ;;  %v3720_v25 = vld [vmem:[%s3752_s2] sm:$0x7] }
  0xa2   :  { %1559 = vmatpush.bf16.msrb.mxu3 %v2190_v28  ;;  %v311_v28 = vperm.slane %v3720_v25, 0  ;;  %v312_v61 = vperm.slane %v3720_v25, 1 }
  0xa3   :  { %1537 = vmatpush.bf16.msra.mxu1 %v1950_v53  ;;  %1525 = vmatmul.bf16.vlgmr.msra.gmra.mxu0 %v2917_v36  ;;  %v2535_v36 = vld [vmem:[%s3751_s1 + $0x568] sm:$0xf0] }
  0xa4   :  { %1569 = vmatpush.bf16.msrb.mxu0 %v2322_v40  ;;  %v2346_v12 = vor.u32 %v2535_v36, %v2345_v5 }
  0xa5   :  { %1547 = vmatpush.bf16.msrb.mxu2 %v2082_v45 }
  0xa6   :  { %1560 = vmatpush.bf16.msrb.mxu3 %v2178_v50  ;;  %1538 = vmatmul.bf16.vlgmr.msra.gmra.mxu1 %v2913_v30  ;;  %v2141_v30 = vld [vmem:[%s3751_s1 + $0x3c8] sm:$0xf] }
  0xa7   :  { %1586 = vmatpush.bf16.msrb.mxu1 %v1281_v56  ;;  %v2142_v19 = vor.u32 %v2484_v33, %v2141_v30  ;;  %v1292_v31 = vpop.f32.mrf.mxu0 }
  0xa8   :  { %1570 = vmatpush.bf16.msrb.mxu0 %v2310_v55  ;;  %v1293_v32 = vadd.f32 %v1292_v31, %v311_v28 }
  0xa9   :  { %1548 = vmatpush.bf16.msrb.mxu2 %v2070_v59  ;;  %v1305_v35 = vpop.f32.mrf.mxu1 }
  0xaa   :  { %1561 = vmatpush.bf16.msrb.mxu3 %v2166_v62  ;;  %v1306_v37 = vadd.f32 %v1305_v35, %v1293_v32 }
  0xab   :  { %1587 = vmatpush.bf16.msrb.mxu1 %v2358_v3 }
  0xac   :  { %1571 = vmatpush.bf16.msrb.mxu0 %v2298_v4  ;;  %v1331_v38 = vpop.f32.mrf.mxu3 }
  0xad   :  { %1549 = vmatpush.bf16.msrb.mxu2 %v2058_v6 }
  0xae   :  { %1562 = vmatpush.bf16.msrb.mxu3 %v2154_v9  ;;  %v1318_v39 = vpop.f32.mrf.mxu2 }
  0xaf   :  { %1588 = vmatpush.bf16.msrb.mxu1 %v2346_v12  ;;  %v1294_v40 = vpop.f32.mrf.mxu0  ;;  %v1319_v44 = vadd.f32 %v1318_v39, %v1306_v37 }
  0xb0   :  { %1572 = vmatpush.bf16.msrb.mxu0 %v2286_v13 }
  0xb1   :  { %1550 = vmatpush.bf16.msrb.mxu2 %v2046_v42  ;;  %v1332_v45 = vadd.f32 %v1331_v38, %v1319_v44 }
  0xb2   :  { %1563 = vmatpush.bf16.msrb.mxu3 %v2142_v19 }
  0xb3   :  { %1589 = vmatpush.bf16.msrb.mxu1 %v2334_v20 }
  0xb4   :  { %1551 = vmatmul.bf16.vlgmr.msrb.gmra.mxu2 %v3054_v41  ;;  %1573 = vmatpush.bf16.msrb.mxu0 %v2274_v21  ;;  %v2250_v41 = vor.u32 %v2511_v27, %v2249_v26  ;;  %v1333_v46 = vpop.f32.mrf.mxu3 }
  0xb5   :  { %1564 = vmatmul.bf16.vlgmr.msrb.gmra.mxu3 %v3058_v47  ;;  %v2508_v47 = vld [vmem:[%s3751_s1 + $0x490] sm:$0xf0] }
  0xb6   :  { %2361 = vmatmul.msk.bf16.vlgmr.msrb.gmra.mxu1 %vm1269_vm1, %v3060_v48  ;;  %v2238_v34 = vor.u32 %v2508_v47, %v2237_v29  ;;  %v1307_v48 = vpop.f32.mrf.mxu1  ;;  %v1320_v49 = vpop.f32.mrf.mxu2 }
  0xb8   :  { %1574 = vmatpush.bf16.msrb.mxu0 %v2262_v24 }
  0xbc   :  { %1575 = vmatpush.bf16.msrb.mxu0 %v2250_v41 }
  0xbf   :  { %v1383_v55 = vpop.f32.mrf.mxu3 }
  0xc0   :  { %1576 = vmatpush.bf16.msrb.mxu0 %v2238_v34  ;;  %v1344_v50 = vpop.f32.mrf.mxu0  ;;  %v313_v34 = vperm.slane %v3720_v25, 2 }
  0xc1   :  { %v1345_v51 = vadd.f32 %v1344_v50, %v1332_v45 }
  0xc3   :  { %1577 = vmatmul.bf16.vlgmr.msrb.gmra.mxu0 %v3056_v43  ;;  %v1357_v52 = vpop.f32.mrf.mxu1 }
  0xc4   :  { %v1358_v53 = vadd.f32 %v1357_v52, %v1345_v51 }
  0xc7   :  { %v1370_v16 = vpop.f32.mrf.mxu2  ;;  %v1385_v60 = vpop.f32.mrf.mxu3 }
  0xc8   :  { %v1371_v54 = vadd.f32 %v1370_v16, %v1358_v53  ;;  %v1346_v56 = vpop.f32.mrf.mxu0 }
  0xca   :  { %v1384_v57 = vadd.f32 %v1383_v55, %v1371_v54 }
  0xcb   :  { %v1359_v58 = vpop.f32.mrf.mxu1 }
  0xcc   :  { %v1595_v42 = vmin.f32 %v1384_v57, 1.0 }
  0xce   :  { %v1598_v21 = vadd.f32 0.5, %v1595_v42 }
  0xcf   :  { %v1372_v59 = vpop.f32.mrf.mxu2 }
  0xd8   :  { %v1396_v62 = vpop.f32.mrf.mxu3 }
  0xd9   :  { %v1397_v43 = vadd.f32 %v1396_v62, %v312_v61 }
  0xe0   :  { %v1409_v63 = vpop.f32.mrf.mxu0  ;;  %v1398_v1 = vpop.f32.mrf.mxu3 }
  0xe1   :  { %v1410_v0 = vadd.f32 %v1409_v63, %v1397_v43 }
  0xe3   :  { %v1422_v2 = vpop.f32.mrf.mxu1 }
  0xe4   :  { %v1423_v3 = vadd.f32 %v1422_v2, %v1410_v0 }
  0xe7   :  { %v1435_v4 = vpop.f32.mrf.mxu2 }
  0xe8   :  { %v1436_v5 = vadd.f32 %v1435_v4, %v1423_v3  ;;  %v1411_v36 = vpop.f32.mrf.mxu0 }
  0xeb   :  { %v1424_v6 = vpop.f32.mrf.mxu1 }
  0xef   :  { %v1437_v7 = vpop.f32.mrf.mxu2 }
  0xf7   :  { %v1487_v9 = vpop.f32.mrf.mxu2 }
  0xf8   :  { %v1448_v8 = vpop.f32.mrf.mxu3 }
  0xf9   :  { %v1449_v10 = vadd.f32 %v1448_v8, %v1436_v5 }
  0xff   :  { %v1489_v12 = vpop.f32.mrf.mxu2 }
 0x100   :  { %v1450_v11 = vpop.f32.mrf.mxu3  ;;  %v1461_v30 = vpop.f32.mrf.mxu0 }
 0x101   :  { %v1462_v33 = vadd.f32 %v1461_v30, %v1449_v10 }
 0x103   :  { %v1474_v13 = vpop.f32.mrf.mxu1 }
 0x104   :  { %v1475_v14 = vadd.f32 %v1474_v13, %v1462_v33 }
 0x106   :  { %v1488_v15 = vadd.f32 %v1487_v9, %v1475_v14 }
 0x108   :  { %v1596_v17 = vmin.f32 %v1488_v15, 1.0  ;;  %v1463_v18 = vpop.f32.mrf.mxu0 }
 0x10a   :  { %v1599_v19 = vadd.f32 0.5, %v1596_v17 }
 0x10b   :  { %v1476_v20 = vpop.f32.mrf.mxu1 }
 0x10c   :  { %v1604_v22 = vrot.slane %v1599_v19, 6 }
 0x10e   :  { %v1607_v23 = vsel %vm1606_vm2, %v1598_v21, %v1604_v22  ;;  %v1610_v24 = vsel %vm1609_vm3, %v1598_v21, %v1604_v22  ;;  %v1615_v26 = vsel %vm1614_vm4, %v1598_v21, %v1604_v22  ;;  %v1619_v27 = vsel %vm1618_vm5, %v1604_v22, %v1598_v21 }
 0x117   :  { %v1500_v28 = vpop.f32.mrf.mxu2 }
 0x118   :  { %v1513_v41 = vpop.f32.mrf.mxu3  ;;  %v1501_v37 = vadd.f32 %v1500_v28, %v313_v34 }
 0x11a   :  { %v1514_v39 = vadd.f32 %v1513_v41, %v1501_v37 }
 0x11f   :  { %v1502_v29 = vpop.f32.mrf.mxu2 }
 0x120   :  { %v1515_v47 = vpop.f32.mrf.mxu3  ;;  %v1526_v31 = vpop.f32.mrf.mxu0 }
 0x121   :  { %v1527_v40 = vadd.f32 %v1526_v31, %v1514_v39 }
 0x123   :  { %v1539_v32 = vpop.f32.mrf.mxu1 }
 0x124   :  { %v1540_v46 = vadd.f32 %v1539_v32, %v1527_v40 }
 0x128   :  { %v1528_v35 = vpop.f32.mrf.mxu0 }
 0x12b   :  { %v1541_v38 = vpop.f32.mrf.mxu1 }
 0x133   :  { %v1591_v44 = vpop.f32.mrf.mxu1 }
 0x137   :  { %v1552_v48 = vpop.f32.mrf.mxu2 }
 0x138   :  { %v1565_v45 = vpop.f32.mrf.mxu3  ;;  %v1553_v49 = vadd.f32 %v1552_v48, %v1540_v46 }
 0x13a   :  { %v1566_v51 = vadd.f32 %v1565_v45, %v1553_v49 }
 0x13b   :  { %v1593_v50 = vpop.f32.mrf.mxu1 }
 0x13f   :  { %v1554_v52 = vpop.f32.mrf.mxu2 }
 0x140   :  { %v1567_v53 = vpop.f32.mrf.mxu3  ;;  %v1578_v16 = vpop.f32.mrf.mxu0 }
 0x141   :  { %v1579_v54 = vadd.f32 %v1578_v16, %v1566_v51 }
 0x143   :  { %v1592_v55 = vadd.f32 %v1591_v44, %v1579_v54 }
 0x145   :  { %v1597_v56 = vmin.f32 %v1592_v55, 1.0 }
 0x147   :  { %v1600_v25 = vadd.f32 0.5, %v1597_v56 }
 0x148   :  { %v1580_v57 = vpop.f32.mrf.mxu0 }
 0x149   :  { %v1605_v58 = vrot.slane %v1600_v25, 4 }
 0x14b   :  { %v1608_v59 = vsel %vm1273_vm0, %v1607_v23, %v1605_v58  ;;  %v1612_v60 = vsel %vm1611_vm8, %v1610_v24, %v1605_v58  ;;  %v1616_v61 = vsel %vm1273_vm0, %v1605_v58, %v1615_v26  ;;  %v1620_v62 = vsel %vm1611_vm8, %v1605_v58, %v1619_v27 }
 0x14c   :  { %v1613_v43 = vrot.slane %v1612_v60, 2  ;;  %v1617_v63 = vrot.slane %v1616_v61, 4  ;;  %v1621_v0 = vrot.slane %v1620_v62, 6  ;;  %1629 = vst.msk [vmem:[#allocation2] sm:$0x3f] %vm1628_vm9, %v1608_v59 }
 0x14e   :  { %1630 = vst.msk [vmem:[#allocation2 + $0x6] sm:$0x3f] %vm1628_vm9, %v1613_v43 }
 0x14f   :  { %1631 = vst.msk [vmem:[#allocation2 + $0xc] sm:$0x3f] %vm1628_vm9, %v1617_v63 }
 0x150   :  { %1632 = vst.msk [vmem:[#allocation2 + $0x12] sm:$0x3f] %vm1628_vm9, %v1621_v0 }
 0x151   :  { %1636 = vsyncadd [#allocation3], 288  ;;  %s1639_s23 = sshll.u32 %s3753_s3, 4  ;;  %s2568_s24 = smov [#allocation2]   ;;  %s1640_s23 = int_to_ptr.hbm [resolvable:$true] %s1639_s23 }
 0x152   :  { %s1637_s25 = sshll.u32 %s2568_s24, 4  ;;  %s2569_s26 = smov 96   ;;  %s1638_s25 = int_to_ptr.vmem [resolvable:$true] %s1637_s25 }
 0x153   :  { %s2570_s0 = smov 6  }
 0x154   :  { %1645 = dma.vmem_to_hbm [thread:$0]  %s1638_s25, 96, %s1640_s23, [#allocation3], %s2569_s26, %s2569_s26, %s2570_s0  }
 0x155   :  { %2566 = dma.done.wait [#allocation3], 384  }
 0x156   :  { %2567 = vsyncadd [#allocation3], 4294966912 }
 0x157   :  { %1650 = vsyncpa [#allocation3], 1 }

</bundles_post_ra>
